<compile_context>
chip_gen: v7x
topology: tpu7x:2x2x1
jax: 0.10.0
libtpu: 0.0.40
codegen_flags: <defaults>
</compile_context>

<pallas_src>
import jax
import jax.numpy as jnp
from jax.experimental import pallas as pl
from jax.experimental.pallas import tpu as pltpu

_TARGET_BLOCK_BYTES = 2 << 20  # ~2 MiB per pipeline buffer


def _pick_t_tile(T, bytes_per_t, target=_TARGET_BLOCK_BYTES):
    """Largest divisor of T whose block stays under `target` bytes (>= 1)."""
    best = 1
    for tt in range(1, T + 1):
        if T % tt == 0 and tt * bytes_per_t <= target:
            best = tt
    return best


def _compiler_params(n_axes):
    return pltpu.CompilerParams(
        dimension_semantics=("parallel",) * n_axes,
        vmem_limit_bytes=32 * 1024 * 1024,  # explicit; safe on v5e/v6e/v7x
    )


def _copy_kernel(x_ref, o_ref):
    # x_ref: (1, 1, tt, P, HW)   o_ref: (tt, P, HW)
    # Single unmasked full-block copy; the permutation lives in the index maps.
    o_ref[...] = x_ref[0, 0]


def _make_scatter_kernel(C, HW):
    def kernel(x_ref, o_ref):
        # x_ref: (1, C, tt, P, HW)   o_ref: (tt, P, C*HW)
        for c in range(C):  # static unroll; masked lane stores if HW % 128 != 0
            o_ref[:, :, c * HW:(c + 1) * HW] = x_ref[0, c]
    return kernel


def _fast_in_map():
    return lambda b, c, ti: (b, c, ti, 0, 0)


def _fast_out_map(n_t):
    def idx(b, c, ti):
        return (b * n_t + ti, 0, c)
    return idx


def _fallback_in_map():
    return lambda b, ti: (b, 0, ti, 0, 0)


def _fallback_out_map(n_t):
    def idx(b, ti):
        return (b * n_t + ti, 0, 0)
    return idx


def patch_embed_forward(x):
    """Pallas equivalent of PatchEmbed.forward.

    x: (B, C, T, P, H, W)  ->  (out, T, P) with out: (B*T, P, C*H*W)
    """
    B, C, T, P, H, W = x.shape
    HW = H * W
    itemsize = x.dtype.itemsize

    # Free wrapper-side reshape: merging the contiguous trailing (H, W) dims.
    x2 = x.reshape(B, C, T, P, HW)

    nbytes = int(x.size) * int(itemsize)
    cost = pl.CostEstimate(flops=0, transcendentals=0, bytes_accessed=2 * nbytes)

    if HW % 128 == 0:
        # Fast path: channel scatter via output BlockSpec, body = 1 block copy.
        tt = _pick_t_tile(T, P * HW * itemsize)
        n_t = T // tt
        out = pl.pallas_call(
            _copy_kernel,
            out_shape=jax.ShapeDtypeStruct((B * T, P, C * HW), x.dtype),
            grid=(B, C, n_t),
            in_specs=[pl.BlockSpec((1, 1, tt, P, HW), _fast_in_map())],
            out_specs=pl.BlockSpec((tt, P, HW), _fast_out_map(n_t)),
            compiler_params=_compiler_params(3),
            cost_estimate=cost,
        )(x2)
    else:
        # Fallback for unaligned HW: output block spans full (P, C*HW) dims
        # (legal tiling for any shape); per-channel stores are masked.
        tt = _pick_t_tile(T, C * P * HW * itemsize)
        n_t = T // tt
        out = pl.pallas_call(
            _make_scatter_kernel(C, HW),
            out_shape=jax.ShapeDtypeStruct((B * T, P, C * HW), x.dtype),
            grid=(B, n_t),
            in_specs=[pl.BlockSpec((1, C, tt, P, HW), _fallback_in_map())],
            out_specs=pl.BlockSpec((tt, P, C * HW), _fallback_out_map(n_t)),
            compiler_params=_compiler_params(2),
            cost_estimate=cost,
        )(x2)

    # PyTorch returns (x, T, W) where W was rebound to x.size(-1) == P.
    return out, T, P


if __name__ == "__main__":
    key = jax.random.PRNGKey(0)

    # Case 1: lane-aligned fast path (H*W = 128).
    B, C, T, P, H, W = 2, 3, 4, 8, 8, 16
    x = jax.random.normal(key, (B, C, T, P, H, W), jnp.float32)
    out, t_out, w_out = patch_embed_forward(x)
    out = jax.block_until_ready(out)
    ref = jnp.transpose(x, (0, 2, 3, 1, 4, 5)).reshape(B * T, P, C * H * W)
    assert out.shape == (B * T, P, C * H * W)
    assert t_out == T and w_out == P
    assert jnp.array_equal(out, ref), "fast-path output mismatches reference"

    # Case 2: unaligned H*W = 64 -> masked-store fallback path.
    B2, C2, T2, P2, H2, W2 = 2, 4, 2, 16, 8, 8
    xb = jax.random.normal(jax.random.PRNGKey(0),
                           (B2, C2, T2, P2, H2, W2), jnp.float32)
    out2, t2, w2 = patch_embed_forward(xb)
    out2 = jax.block_until_ready(out2)
    ref2 = jnp.transpose(xb, (0, 2, 3, 1, 4, 5)).reshape(
        B2 * T2, P2, C2 * H2 * W2)
    assert out2.shape == ref2.shape
    assert t2 == T2 and w2 == P2
    assert jnp.array_equal(out2, ref2), "fallback output mismatches reference"

    print("KERNEL_OK")
</pallas_src>

<mosaic_0001>
module attributes {stable_mosaic.version = 11 : i64} {
  func.func @_copy_kernel(%arg0: i32, %arg1: i32, %arg2: i32, %arg3: memref<1x1x4x8x128xf32, #tpu.memory_space<vmem>>, %arg4: memref<4x8x128xf32, #tpu.memory_space<vmem>>) attributes {dimension_semantics = [#tpu.dimension_semantics<parallel>, #tpu.dimension_semantics<parallel>, #tpu.dimension_semantics<parallel>], iteration_bounds = array<i64: 2, 3, 1>, scalar_prefetch = 0 : i64, scratch_operands = 0 : i64, tpu.core_type = #tpu.core_type<tc>, window_params = [{transform_indices = @transform_0, window_bounds = array<i64: 1, 1, 4, 8, 128>}, {transform_indices = @transform_1, window_bounds = array<i64: 4, 8, 128>}]} {
    %c0 = arith.constant 0 : index
    %c0_0 = arith.constant 0 : index
    %c0_1 = arith.constant 0 : index
    %c0_2 = arith.constant 0 : index
    %c0_3 = arith.constant 0 : index
    %0 = vector.load %arg3[%c0, %c0_0, %c0_1, %c0_2, %c0_3] : memref<1x1x4x8x128xf32, #tpu.memory_space<vmem>>, vector<1x1x4x8x128xf32>
    %1 = vector.shape_cast %0 : vector<1x1x4x8x128xf32> to vector<4x8x128xf32>
    %c0_4 = arith.constant 0 : index
    %c0_5 = arith.constant 0 : index
    %c0_6 = arith.constant 0 : index
    %2 = vector.load %arg4[%c0_4, %c0_5, %c0_6] : memref<4x8x128xf32, #tpu.memory_space<vmem>>, vector<4x8x128xf32>
    tpu.vector_store %arg4[%c0_4, %c0_5, %c0_6], %1 {strides = array<i32>} : memref<4x8x128xf32, #tpu.memory_space<vmem>>, vector<4x8x128xf32>,
    return
  }
  func.func @transform_0(%arg0: i32, %arg1: i32, %arg2: i32) -> (i32, i32, i32, i32, i32) {
    %c0_i32 = arith.constant 0 : i32
    %c0_i32_0 = arith.constant 0 : i32
    %c0_i32_1 = arith.constant 0 : i32
    return %arg0, %arg1, %arg2, %c0_i32, %c0_i32_0 : i32, i32, i32, i32, i32
  }
  func.func @transform_1(%arg0: i32, %arg1: i32, %arg2: i32) -> (i32, i32, i32) {
    %c1_i32 = arith.constant 1 : i32
    %0 = arith.muli %arg0, %c1_i32 : i32
    %1 = arith.addi %0, %arg2 : i32
    %c0_i32 = arith.constant 0 : i32
    %c0_i32_0 = arith.constant 0 : i32
    return %1, %c0_i32, %arg1 : i32, i32, i32
  }
}

</mosaic_0001>

<bundles_post_ra>
// kernel: tpu_custom_call.1
= control target key start
LH: loop header
LB: loop body
LE: loop exit
PB: predicated region body
PF: predicated region fallthrough
CT: control target
= control target key end

     0   :  { %6 = vsyncpa [#allocation3], 0  ;;  %s732_s0 = inlined_call_operand.hbm [shape: f32[2,3,4,8,128], index: 0, kind: input, shape index: {}]   ;;  %s733_s1 = inlined_call_operand.hbm [shape: f32[8,8,384], index: 1, kind: output, shape index: {}]  }
   0x1   :  { %8 = vsyncpa [#allocation3 + $0x1], 0 }
   0x2   :  { %9 = vsyncpa [#allocation4], 0 }
   0x3   :  { %11 = vsyncpa [#allocation4 + $0x1], 0  ;;  %s537_s6 = smov 0   ;;  %s539_s7 = smov 0  }
   0x4   :  { %s541_s8 = smov 0   ;;  %s543_s9 = smov 0  }
   0x5   :  { %s545_s10 = smov 0   ;;  %s547_s11 = smov 0  }
   0x6   :  { %s549_s12 = smov 0   ;;  %s551_s13 = smov 0  }
   0x7 LB: > { %s289_s14 = sadd.s32 4294967295, %s518_s13   ;;  %s290_s15 = sadd.s32 4294967294, %s518_s13   ;;  %s518_s13 = sphi %s551_s13, %s17_s13   ;;  %s514_s12 = sphi %s549_s12, %s748_s12   ;;  %s510_s11 = sphi %s547_s11, %s747_s11   ;;  %s506_s10 = sphi %s545_s10, %s746_s10   ;;  %s502_s9 = sphi %s543_s9, %s745_s9   ;;  %s498_s8 = sphi %s541_s8, %s744_s8   ;;  %s494_s7 = sphi %s539_s7, %s743_s7   ;;  %s490_s6 = sphi %s537_s6, %s742_s6  }
   0x8   : > { %s32_s16 = sadd.s32 1, %s510_s11  ;;  %s36_s17 = sadd.s32 1, %s514_s12 }
   0x9   : > { %p34_p0 = scmp.ge.s32.totalorder %s32_s16, 3  ;;  %s47_s18 = sadd.s32 1, %s498_s8 }
   0xa   : > { %p54_p1 = scmp.ne.s32.totalorder %s498_s8, %s494_s7  ;;  %p55_p2 = scmp.eq.s32.totalorder %s518_s13, 0 }
   0xb   : > { %s750_s16 = smov (%p34_p0, %s32_s16), 0  ;;  %s752_s17 = smov (!%p34_p0, %s36_s17), %s514_s12 }
   0xc   : > { %s41_s19 = ssub.s32 %s510_s11, %s750_s16  ;;  %p590_p3 = por %p55_p2, %p54_p1 }
   0xd   : > { %p38_p4 = scmp.ge.s32.totalorder %s752_s17, 2  ;;  %p60_p5 = scmp.ne.s32.totalorder %s494_s7, %s490_s6 }
   0xe   : > { %p61_p6 = scmp.eq.s32.totalorder %s289_s14, 0  ;;  %p88_p7 = scmp.eq.s32.totalorder %s289_s14, 5 }
   0xf   : > { %s754_s17 = smov (%p38_p4, %s752_s17), 0  ;;  %p94_p10 = scmp.eq.s32.totalorder %s290_s15, 5 }
  0x10   : > { %p598_p8 = por %p61_p6, %p60_p5  ;;  %p602_p9 = por %p88_p7, %p54_p1 }
  0x11   : > { %s40_s23 = ssub.s32 %s514_s12, %s754_s17  ;;  %p608_p12 = por %p94_p10, %p60_p5 }
  0x12   : > { %s737_s22 = scalar_select %p602_p9, 1, 0 }
  0x13   : > { %s42_s24 = sor.u32 %s41_s19, %s40_s23  ;;  %p319_p13 = scmp.lt.s32.totalorder %s518_s13, 6 }
  0x14   : > { %p45_p11 = scmp.eq.s32.totalorder %s42_s24, 0  ;;  %s114_s26 = sand.u32 1, %s498_s8  }
  0x15   : > { %s738_s25 = scalar_select %p608_p12, 1, 0 }
  0x16   : > { %s615_s27 = scalar_select %p45_p11, %s498_s8, %s47_s18  }
  0x17   : > { %s293_s28 = sshll.u32 %s114_s26, 5  ;;  %s294_s29 = sshll.u32 %s510_s11, 2 }
  0x18   : > { %s305_s30 = smul.u32 12, %s514_s12  ;;  %s118_s2 = scalar_lea.vmem [#allocation2], %s293_s28 }
  0x19   : > { %s129_s3 = sshll.u32 %s118_s2, 4  ;;  %p623_p0 = pnand %p319_p13, %p590_p3  ;;  %s619_s3 = int_to_ptr.vmem [resolvable:$true] %s129_s3 }
  0x1a   : > { %s126_s5 = sadd.s32 %s305_s30, %s294_s29  ;;  %s632_s23 = scalar_lea.sflag [#allocation3], %s114_s26 }
  0x1b   : > { %s295_s14 = sshll.u32 %s126_s5, 7  ;;  %p392_p2 = pneg %p623_p0 }
  0x1c   : > { %s630_s18 = scalar_lea.hbm %s732_s0, %s295_s14  ;;  %s395_s29 = scalar_lea.hbm %s732_s0, 3072 }
  0x1d   : > { %s390_s20 = scalar_lea.hbm %s630_s18, 512  ;;  %p396_p5 = scmp.lt.u32.totalorder %s630_s18, %s732_s0 }
  0x1e   : > { %p391_p1 = scmp.ne.s32.totalorder %s630_s18, %s390_s20  ;;  %p397_p6 = scmp.lt.u32.totalorder %s395_s29, %s390_s20 }
  0x1f   : > { %p399_p10 = scmp.lt.u32.totalorder %s390_s20, %s630_s18 }
  0x20   : > { %p393_p3 = pnand %p392_p2, %p391_p1  ;;  %p398_p7 = por %p397_p6, %p396_p5 }
  0x22   : > { %p394_p4 = pneg %p393_p3  ;;  %p400_p11 = por %p399_p10, %p398_p7 }
  0x24   : > { %p401_p13 = pnand %p400_p11, %p394_p4 }
  0x26   : > { %404 = shalt.err (!%p401_p13)
}
  0x27   : > { %s405_s26 = scalar_lea.vmem %s619_s3, 512  ;;  %s520_s5 = smov [#allocation2]  }
  0x28   : > { %p406_p1 = scmp.ne.s32.totalorder %s619_s3, %s405_s26  ;;  %s410_s14 = sshll.u32 %s520_s5, 4  ;;  %s411_s14 = int_to_ptr.vmem [resolvable:$false] %s410_s14 }
  0x29   : > { %s412_s15 = scalar_lea.vmem %s411_s14, 1024  ;;  %p413_p9 = scmp.lt.s32.totalorder %s619_s3, %s411_s14 }
  0x2a   : > { %p408_p3 = pnand %p406_p1, %p392_p2  ;;  %p414_p5 = scmp.lt.s32.totalorder %s412_s15, %s405_s26 }
  0x2c   : > { %p409_p12 = pneg %p408_p3  ;;  %p415_p6 = por %p414_p5, %p413_p9 }
  0x2e   : > { %p416_p7 = pnand %p415_p6, %p409_p12 }
  0x30   : > { %419 = shalt.err (!%p416_p7)
}
  0x31   : > { %s521_s19 = smov 128   ;;  %s522_s20 = smov 8  }
  0x32   : > { %314 = dma.hbm_to_vmem [thread:$0]  (!%p623_p0), %s630_s18, 512, %s619_s3, %s632_s23, %s521_s19, %s521_s19, %s522_s20  }
  0x33   : > { %p296_p2 = scmp.ge.s32.totalorder %s518_s13, 1  ;;  %p137_p4 = scmp.lt.s32.totalorder %s518_s13, 7 }
  0x35   : > { %p138_p10 = pnand %p296_p2, %p137_p4 }
  0x36   : > { %s663_s24 = sand.u32 (!%p138_p10), 1, %s494_s7  }
  0x37   : > { %141 = sbr.rel (%p138_p10) target bundleno = 92 (0x5c), region = 24  ;;  %s297_s28 = sshll.u32 (!%p138_p10), %s663_s24, 5 }
  0x38   : > { %s144_s29 = scalar_lea.sflag (!%p138_p10), [#allocation3], %s663_s24  ;;  %s147_s30 = scalar_lea.vmem (!%p138_p10), [#allocation2], %s297_s28 }
  0x3e   : > { %481 = dma.done.wait (%p598_p8), %s144_s29, 512  }
  0x3f   : > { %483 = vsyncadd (%p598_p8), %s144_s29, 4294966784  ;;  %s306_s3 = smul.u32 12, %s506_s10  ;;  %s165_s4 = scalar_lea.vmem [#allocation5], %s297_s28  ;;  %v169_v0 = vld [vmem:[%s147_s30] sm:$0xff]  ;;  %v170_v1 = vld [vmem:[%s147_s30 + $0x8] sm:$0xff] }
  0x40   : > { %s194_s18 = sshll.u32 %s165_s4, 4  ;;  %v171_v2 = vld [vmem:[%s147_s30 + $0x10] sm:$0xff]  ;;  %173 = vst [vmem:[%s165_s4] sm:$0xff] %v169_v0  ;;  %174 = vst [vmem:[%s165_s4 + $0x8] sm:$0xff] %v170_v1  ;;  %v172_v3 = vld [vmem:[%s147_s30 + $0x18] sm:$0xff]  ;;  %p740_p9 = scmp.ne.s32.totalorder %s737_s22, 0  ;;  %s673_s18 = int_to_ptr.vmem [resolvable:$true] %s194_s18 }
  0x41   : > { %s191_s23 = sadd.s32 %s502_s9, %s306_s3  ;;  %175 = vst [vmem:[%s165_s4 + $0x10] sm:$0xff] %v171_v2  ;;  %176 = vst [vmem:[%s165_s4 + $0x18] sm:$0xff] %v172_v3  ;;  %s178_s9 = scalar_lea.sflag [#allocation4], %s663_s24 }
  0x42   : > { %s302_s2 = sshll.u32 %s191_s23, 7  ;;  %s420_s10 = scalar_lea.vmem %s673_s18, 512 }
  0x43   : > { %s678_s21 = scalar_lea.hbm %s733_s1, %s302_s2  ;;  %p421_p8 = scmp.ne.s32.totalorder %s673_s18, %s420_s10 }
  0x44   : > { %s523_s14 = smov [#allocation5]  }
  0x45   : > { %p422_p12 = pnand %p421_p8, %p740_p9  ;;  %s424_s15 = sshll.u32 %s523_s14, 4  ;;  %s425_s15 = int_to_ptr.vmem [resolvable:$false] %s424_s15 }
  0x46   : > { %s426_s19 = scalar_lea.vmem %s425_s15, 1024  ;;  %p427_p11 = scmp.lt.s32.totalorder %s673_s18, %s425_s15 }
  0x47   : > { %p423_p0 = pneg %p422_p12  ;;  %p428_p13 = scmp.lt.s32.totalorder %s426_s19, %s420_s10 }
  0x49   : > { %p429_p1 = por %p428_p13, %p427_p11 }
  0x4b   : > { %p430_p3 = pnand %p429_p1, %p423_p0 }
  0x4d   : > { %433 = shalt.err (!%p430_p3)
}
  0x4e   : > { %s434_s20 = scalar_lea.hbm %s678_s21, 512  ;;  %s438_s30 = scalar_lea.hbm %s733_s1, 3072 }
  0x4f   : > { %p435_p5 = scmp.ne.s32.totalorder %s678_s21, %s434_s20  ;;  %p439_p2 = scmp.lt.u32.totalorder %s678_s21, %s733_s1 }
  0x50   : > { %p440_p4 = scmp.lt.u32.totalorder %s438_s30, %s434_s20  ;;  %p442_p8 = scmp.lt.u32.totalorder %s434_s20, %s678_s21 }
  0x51   : > { %p436_p6 = pnand %p435_p5, %p740_p9 }
  0x52   : > { %p441_p10 = por %p440_p4, %p439_p2 }
  0x53   : > { %p437_p7 = pneg %p436_p6 }
  0x54   : > { %p443_p12 = por %p442_p8, %p441_p10 }
  0x56   : > { %p444_p0 = pnand %p443_p12, %p437_p7 }
  0x58   : > { %447 = shalt.err (!%p444_p0)
}
  0x59   : > { %s524_s23 = smov 128   ;;  %s525_s2 = smov 384  }
  0x5a   : > { %s526_s26 = smov 8  }
  0x5b   : > { %309 = dma.vmem_to_hbm [thread:$0]  (%p740_p9), %s673_s18, 512, %s678_s21, %s178_s9, %s524_s23, %s525_s2, %s526_s26  }
  0x5c PF: > { %p320_p11 = scmp.ge.s32.totalorder %s518_s13, 2  ;;  %s209_s5 = sand.u32 1, %s490_s6  }
  0x5d   : > { %p741_p13 = scmp.ne.s32.totalorder %s738_s25, 0  ;;  %s210_s10 = scalar_lea.sflag [#allocation4], %s209_s5 }
  0x5f   : > { %p316_p1 = pnand %p320_p11, %p741_p13 }
  0x61   : > { %485 = dma.done.wait (!%p316_p1), %s210_s10, 512  }
  0x62   : > { %487 = vsyncadd (!%p316_p1), %s210_s10, 4294966784  ;;  %s17_s13 = sadd.s32 1, %s518_s13   ;;  %s742_s6 = smov %s494_s7 }
  0x63   : > { %p14_p3 = scmp.ge.s32.totalorder %s17_s13, 8   ;;  %s743_s7 = smov %s498_s8 }
  0x64   : > { %s744_s8 = smov %s615_s27  ;;  %s745_s9 = smov %s510_s11 }
  0x65   : > { %s746_s10 = smov %s514_s12  ;;  %s747_s11 = smov %s750_s16 }
  0x66   : > { %s748_s12 = smov %s754_s17  ;;  %16 = sbr.rel (!%p14_p3) target bundleno = 7 (0x7), region = 69 }
  0x6d   :  { %215 = vsyncpa [#allocation3], 1 }
  0x6e   :  { %217 = vsyncpa [#allocation3 + $0x1], 1 }
  0x6f   :  { %218 = vsyncpa [#allocation4], 1 }
  0x70   :  { %220 = vsyncpa [#allocation4 + $0x1], 1 }

</bundles_post_ra>
